<compile_context>
chip_gen: v7x
topology: tpu7x:2x2x1
jax: 0.10.0
libtpu: 0.0.40
codegen_flags: <defaults>
</compile_context>

<pallas_src>
import functools

import jax
import jax.numpy as jnp
from jax import lax
from jax.experimental import pallas as pl
from jax.experimental.pallas import tpu as pltpu


# --------------------------------------------------------------------------
# Plain-JAX glue: prior <-> GT matching (box_utils.match / encode / encode_landm).
# Data-dependent argmax / gather target preparation; vmapped over the batch.
# --------------------------------------------------------------------------
def point_form(boxes):
    # (cx, cy, w, h) -> (xmin, ymin, xmax, ymax)
    return jnp.concatenate(
        [boxes[:, :2] - boxes[:, 2:] / 2.0, boxes[:, :2] + boxes[:, 2:] / 2.0],
        axis=1,
    )


def _intersect(box_a, box_b):
    max_xy = jnp.minimum(box_a[:, None, 2:], box_b[None, :, 2:])
    min_xy = jnp.maximum(box_a[:, None, :2], box_b[None, :, :2])
    inter = jnp.maximum(max_xy - min_xy, 0.0)
    return inter[..., 0] * inter[..., 1]


def _jaccard(box_a, box_b):
    inter = _intersect(box_a, box_b)
    area_a = ((box_a[:, 2] - box_a[:, 0]) * (box_a[:, 3] - box_a[:, 1]))[:, None]
    area_b = ((box_b[:, 2] - box_b[:, 0]) * (box_b[:, 3] - box_b[:, 1]))[None, :]
    return inter / (area_a + area_b - inter)


def _encode(matched, priors, variances):
    g_cxcy = (matched[:, :2] + matched[:, 2:]) / 2.0 - priors[:, :2]
    g_cxcy = g_cxcy / (variances[0] * priors[:, 2:])
    g_wh = (matched[:, 2:] - matched[:, :2]) / priors[:, 2:]
    g_wh = jnp.log(g_wh) / variances[1]
    return jnp.concatenate([g_cxcy, g_wh], axis=1)


def _encode_landm(matched, priors, variances):
    m = matched.reshape(matched.shape[0], 5, 2)
    pr = jnp.broadcast_to(priors[:, None, :], (priors.shape[0], 5, 4))
    g = (m - pr[:, :, :2]) / (variances[0] * pr[:, :, 2:])
    return g.reshape(g.shape[0], -1)


def _match_one(truths, labels, landms, valid, priors, *, threshold, variances):
    """box_utils.match() for one (padded) image. `valid` masks padded GT rows."""
    P = priors.shape[0]
    M = truths.shape[0]

    overlaps = _jaccard(truths, point_form(priors))            # (M, P)
    overlaps = jnp.where(valid[:, None], overlaps, -1.0)       # padded GTs never match

    best_prior_overlap = overlaps.max(axis=1)                  # (M,)
    best_prior_idx = overlaps.argmax(axis=1)                   # (M,)
    valid_gt = valid & (best_prior_overlap >= 0.2)
    any_valid = jnp.any(valid_gt)

    best_truth_overlap = overlaps.max(axis=0)                  # (P,)
    best_truth_idx = overlaps.argmax(axis=0)                   # (P,)

    prior_iota = jnp.arange(P)
    gt_iota = jnp.arange(M)

    # index_fill_(0, best_prior_idx_filter, 2): best prior of each filtered GT
    hit = valid_gt[:, None] & (best_prior_idx[:, None] == prior_iota[None, :])  # (M, P)
    best_truth_overlap = jnp.where(jnp.any(hit, axis=0), 2.0, best_truth_overlap)

    # ensure every real GT j claims its best prior; later j wins (torch loop order)
    claim = valid[:, None] & (best_prior_idx[:, None] == prior_iota[None, :])   # (M, P)
    claimed_j = jnp.max(jnp.where(claim, gt_iota[:, None], -1), axis=0)         # (P,)
    best_truth_idx = jnp.where(claimed_j >= 0, claimed_j, best_truth_idx)

    matches = truths[best_truth_idx]                           # (P, 4)
    conf = labels[best_truth_idx].astype(jnp.int32)            # (P,)
    conf = jnp.where(best_truth_overlap < threshold, 0, conf)  # background
    loc = _encode(matches, priors, variances)
    landm = _encode_landm(landms[best_truth_idx], priors, variances)

    # early-return branch of match() when no GT passes the 0.2 filter
    loc = jnp.where(any_valid, loc, jnp.zeros_like(loc))
    conf = jnp.where(any_valid, conf, jnp.zeros_like(conf))
    landm = jnp.where(any_valid, landm, jnp.zeros_like(landm))
    return loc, conf, landm


# --------------------------------------------------------------------------
# Pallas kernel: per-image loss partials (smooth-L1, LSE, hard-neg mining, CE).
# All tensors are lane-major: (feat, P) with P on the 128-wide lane axis.
# --------------------------------------------------------------------------
def _multibox_loss_kernel(loc_p_ref, conf_p_ref, landm_p_ref,
                          loc_t_ref, landm_t_ref, conf_t_ref,
                          out_ref, *, negpos_ratio, num_classes):
    loc_p = loc_p_ref[0]        # (4,  P)
    conf = conf_p_ref[0]        # (C,  P)
    landm_p = landm_p_ref[0]    # (10, P)
    loc_t = loc_t_ref[0]        # (4,  P)
    landm_t = landm_t_ref[0]    # (10, P)
    conf_t = conf_t_ref[0]      # (1,  P) int32

    P = loc_p.shape[-1]
    C = num_classes

    # ---- landmark smooth-L1 loss over priors with label > 0 ----
    pos1 = conf_t > 0                                            # (1, P)
    n_pos_landm = jnp.sum(pos1.astype(jnp.float32))
    d1 = landm_p - landm_t
    a1 = jnp.abs(d1)
    sl1 = jnp.where(a1 < 1.0, 0.5 * d1 * d1, a1 - 0.5)           # (10, P)
    loss_landm = jnp.sum(jnp.where(pos1, sl1, 0.0))

    # ---- localization smooth-L1 loss over priors with label != 0 ----
    pos = conf_t != 0                                            # (1, P)
    n_pos = jnp.sum(pos.astype(jnp.float32))
    d2 = loc_p - loc_t
    a2 = jnp.abs(d2)
    sl2 = jnp.where(a2 < 1.0, 0.5 * d2 * d2, a2 - 0.5)           # (4, P)
    loss_l = jnp.sum(jnp.where(pos, sl2, 0.0))

    # ---- per-prior classification loss: log_sum_exp(x) - x[target] ----
    conf_t_mod = jnp.where(pos, 1, conf_t)                       # conf_t[pos] = 1 -> {0,1}
    if C == 2:
        # specialized 2-class path: no iota gather, exp/log go to the EUP
        x0 = conf[0:1, :]
        x1 = conf[1:2, :]
        lse = jnp.maximum(x0, x1) + jnp.log(1.0 + jnp.exp(-jnp.abs(x0 - x1)))
        gathered = jnp.where(conf_t_mod == 1, x1, x0)
    else:
        row_max = jnp.max(conf, axis=0, keepdims=True)
        lse = jnp.log(jnp.sum(jnp.exp(conf - row_max), axis=0, keepdims=True)) + row_max
        cls_iota = lax.broadcasted_iota(jnp.int32, (C, P), 0)
        gathered = jnp.sum(jnp.where(cls_iota == conf_t_mod, conf, 0.0),
                           axis=0, keepdims=True)
    loss_c = lse - gathered                                      # (1, P)
    loss_c_mine = jnp.where(pos, 0.0, loss_c)                    # loss_c[pos] = 0

    # ---- hard negative mining: exact sum of the num_neg largest loss_c_mine ----
    # sum over (pos|neg) of CE == sum_pos loss_c + sum(top-num_neg of loss_c_mine),
    # which is independent of how ties are broken in the descending sort.
    kf = jnp.minimum(negpos_ratio * n_pos, float(P - 1))         # num_neg (float)

    lc_i = loss_c_mine[:, :, None]                               # (1, P, 1)
    lc_j = loss_c_mine[:, None, :]                               # (1, 1, P)
    gt_cnt = jnp.sum((lc_j > lc_i).astype(jnp.float32), axis=2)  # (1, P)
    ge_cnt = jnp.sum((lc_j >= lc_i).astype(jnp.float32), axis=2) # (1, P)

    # t_star = kf-th largest value of loss_c_mine (exists whenever kf >= 1)
    is_kth = (gt_cnt < kf) & (kf <= ge_cnt)
    t_star = jnp.max(jnp.where(is_kth, loss_c_mine, -jnp.inf))
    above = loss_c_mine > t_star
    n_above = jnp.sum(above.astype(jnp.float32))
    sum_above = jnp.sum(jnp.where(above, loss_c_mine, 0.0))
    neg_sum = jnp.where(kf > 0.0, sum_above + (kf - n_above) * t_star, 0.0)

    loss_c_sum = jnp.sum(jnp.where(pos, loss_c, 0.0)) + neg_sum

    # ---- per-image partials packed into a lane-dense (1, 128) output row ----
    lane = lax.broadcasted_iota(jnp.int32, (1, 128), 1)
    out = jnp.where(lane == 0, loss_l,
          jnp.where(lane == 1, loss_c_sum,
          jnp.where(lane == 2, loss_landm,
          jnp.where(lane == 3, n_pos,
          jnp.where(lane == 4, n_pos_landm, 0.0)))))
    out_ref[...] = out[None].astype(jnp.float32)


def _multibox_loss_pallas(loc_data, conf_data, landm_data, loc_t, landm_t, conf_t,
                          *, negpos_ratio):
    B, P, _ = loc_data.shape
    C = conf_data.shape[-1]

    # lane-major layout: priors on the 128-wide lane axis
    loc_p_t = jnp.transpose(loc_data, (0, 2, 1))       # (B, 4, P)
    conf_p_t = jnp.transpose(conf_data, (0, 2, 1))     # (B, C, P)
    landm_p_t = jnp.transpose(landm_data, (0, 2, 1))   # (B, 10, P)
    loc_t_t = jnp.transpose(loc_t, (0, 2, 1))          # (B, 4, P)
    landm_t_t = jnp.transpose(landm_t, (0, 2, 1))      # (B, 10, P)
    conf_t_t = conf_t[:, None, :]                      # (B, 1, P) int32

    kernel = functools.partial(_multibox_loss_kernel,
                               negpos_ratio=negpos_ratio, num_classes=C)
    out = pl.pallas_call(
        kernel,
        out_shape=jax.ShapeDtypeStruct((B, 1, 128), jnp.float32),
        grid=(B,),
        in_specs=[
            pl.BlockSpec((1, 4, P),  lambda b: (b, 0, 0)),
            pl.BlockSpec((1, C, P),  lambda b: (b, 0, 0)),
            pl.BlockSpec((1, 10, P), lambda b: (b, 0, 0)),
            pl.BlockSpec((1, 4, P),  lambda b: (b, 0, 0)),
            pl.BlockSpec((1, 10, P), lambda b: (b, 0, 0)),
            pl.BlockSpec((1, 1, P),  lambda b: (b, 0, 0)),
        ],
        out_specs=pl.BlockSpec((1, 1, 128), lambda b: (b, 0, 0)),
        compiler_params=pltpu.CompilerParams(
            dimension_semantics=("parallel",),       # per-image blocks -> megacore-safe
            vmem_limit_bytes=32 * 1024 * 1024),
    )(loc_p_t, conf_p_t, landm_p_t, loc_t_t, landm_t_t, conf_t_t)

    per_img = out[:, 0, :]                              # (B, 128)
    loss_l = jnp.sum(per_img[:, 0])
    loss_c = jnp.sum(per_img[:, 1])
    loss_landm = jnp.sum(per_img[:, 2])
    N = jnp.maximum(jnp.sum(per_img[:, 3]), 1.0)
    N1 = jnp.maximum(jnp.sum(per_img[:, 4]), 1.0)
    return loss_l / N, loss_c / N, loss_landm / N1


@functools.partial(jax.jit,
                   static_argnames=("overlap_thresh", "negpos_ratio", "variances"))
def _multibox_loss_jit(loc_data, conf_data, landm_data, priors,
                       tgt_boxes, tgt_landms, tgt_labels, tgt_valid,
                       *, overlap_thresh, negpos_ratio, variances):
    match_fn = functools.partial(_match_one, threshold=overlap_thresh,
                                 variances=variances)
    loc_t, conf_t, landm_t = jax.vmap(match_fn, in_axes=(0, 0, 0, 0, None))(
        tgt_boxes, tgt_labels, tgt_landms, tgt_valid, priors)
    return _multibox_loss_pallas(
        loc_data, conf_data, landm_data,
        loc_t.astype(jnp.float32), landm_t.astype(jnp.float32),
        conf_t.astype(jnp.int32),
        negpos_ratio=negpos_ratio)


# --------------------------------------------------------------------------
# Wrapper: MultiBoxLoss.forward
# --------------------------------------------------------------------------
def multibox_loss_forward(predictions, priors, targets, *,
                          overlap_thresh=0.35, negpos_ratio=7,
                          variances=(0.1, 0.2)):
    loc_data, conf_data, landm_data = predictions
    max_objs = max(int(t.shape[0]) for t in targets)

    boxes, landms, labels, valid = [], [], [], []
    for t in targets:
        n = int(t.shape[0])
        pad = max_objs - n
        boxes.append(jnp.pad(t[:, :4], ((0, pad), (0, 0))))
        landms.append(jnp.pad(t[:, 4:14], ((0, pad), (0, 0))))
        labels.append(jnp.pad(t[:, 14], ((0, pad),)))
        valid.append(jnp.arange(max_objs) < n)
    tgt_boxes = jnp.stack(boxes).astype(jnp.float32)    # (B, max_objs, 4)
    tgt_landms = jnp.stack(landms).astype(jnp.float32)  # (B, max_objs, 10)
    tgt_labels = jnp.stack(labels).astype(jnp.float32)  # (B, max_objs)
    tgt_valid = jnp.stack(valid)                        # (B, max_objs) bool

    return _multibox_loss_jit(loc_data, conf_data, landm_data, priors,
                              tgt_boxes, tgt_landms, tgt_labels, tgt_valid,
                              overlap_thresh=float(overlap_thresh),
                              negpos_ratio=int(negpos_ratio),
                              variances=tuple(float(v) for v in variances))


# --------------------------------------------------------------------------
if __name__ == "__main__":
    key = jax.random.PRNGKey(0)
    B, P, C = 2, 128, 2            # batch, num_priors, num_classes

    # priors on an 8x16 grid, size 0.2, in (cx, cy, w, h)
    gy, gx = jnp.meshgrid(jnp.linspace(0.10, 0.90, 8),
                          jnp.linspace(0.05, 0.95, 16), indexing="ij")
    priors = jnp.stack(
        [gx.reshape(-1), gy.reshape(-1),
         jnp.full((P,), 0.2), jnp.full((P,), 0.2)], axis=1).astype(jnp.float32)

    k1, k2, k3, k4, k5 = jax.random.split(key, 5)
    loc_data = 0.1 * jax.random.normal(k1, (B, P, 4), dtype=jnp.float32)
    conf_data = jax.random.normal(k2, (B, P, C), dtype=jnp.float32)
    landm_data = 0.1 * jax.random.normal(k3, (B, P, 10), dtype=jnp.float32)

    def make_targets(k, prior_ids, labels):
        kj, kl = jax.random.split(k, 2)
        pf = point_form(priors[jnp.array(prior_ids)])
        boxes = jnp.clip(pf + 0.01 * jax.random.normal(kj, pf.shape), 0.0, 1.0)
        landms = jax.random.uniform(kl, (len(prior_ids), 10), dtype=jnp.float32)
        lab = jnp.array(labels, dtype=jnp.float32)[:, None]
        return jnp.concatenate([boxes, landms, lab], axis=1).astype(jnp.float32)

    targets = [
        make_targets(k4, [5, 40, 77, 100], [1.0, -1.0, 1.0, 1.0]),
        make_targets(k5, [12, 33, 64, 120], [1.0, 1.0, -1.0, 1.0]),
    ]

    loss_l, loss_c, loss_landm = multibox_loss_forward(
        (loc_data, conf_data, landm_data), priors, targets,
        overlap_thresh=0.35, negpos_ratio=7)
    jax.block_until_ready((loss_l, loss_c, loss_landm))

    assert bool(jnp.isfinite(loss_l)) and bool(jnp.isfinite(loss_c)) and bool(jnp.isfinite(loss_landm))
    print("KERNEL_OK")
</pallas_src>

<mosaic_0001>
module attributes {stable_mosaic.version = 11 : i64} {
  func.func @_multibox_loss_kernel(%arg0: i32, %arg1: memref<1x4x128xf32, #tpu.memory_space<vmem>>, %arg2: memref<1x2x128xf32, #tpu.memory_space<vmem>>, %arg3: memref<1x10x128xf32, #tpu.memory_space<vmem>>, %arg4: memref<1x4x128xf32, #tpu.memory_space<vmem>>, %arg5: memref<1x10x128xf32, #tpu.memory_space<vmem>>, %arg6: memref<1x1x128xi32, #tpu.memory_space<vmem>>, %arg7: memref<1x1x128xf32, #tpu.memory_space<vmem>>) attributes {dimension_semantics = [#tpu.dimension_semantics<parallel>], iteration_bounds = array<i64: 2>, scalar_prefetch = 0 : i64, scratch_operands = 0 : i64, tpu.core_type = #tpu.core_type<tc>, window_params = [{transform_indices = @transform_0, window_bounds = array<i64: 1, 4, 128>}, {transform_indices = @transform_1, window_bounds = array<i64: 1, 2, 128>}, {transform_indices = @transform_2, window_bounds = array<i64: 1, 10, 128>}, {transform_indices = @transform_3, window_bounds = array<i64: 1, 4, 128>}, {transform_indices = @transform_4, window_bounds = array<i64: 1, 10, 128>}, {transform_indices = @transform_5, window_bounds = array<i64: 1, 1, 128>}, {transform_indices = @transform_6, window_bounds = array<i64: 1, 1, 128>}]} {
    %c0 = arith.constant 0 : index
    %c0_0 = arith.constant 0 : index
    %c0_1 = arith.constant 0 : index
    %0 = vector.load %arg1[%c0, %c0_0, %c0_1] : memref<1x4x128xf32, #tpu.memory_space<vmem>>, vector<1x4x128xf32>
    %1 = vector.shape_cast %0 : vector<1x4x128xf32> to vector<4x128xf32>
    %c0_2 = arith.constant 0 : index
    %c0_3 = arith.constant 0 : index
    %c0_4 = arith.constant 0 : index
    %2 = vector.load %arg2[%c0_2, %c0_3, %c0_4] : memref<1x2x128xf32, #tpu.memory_space<vmem>>, vector<1x2x128xf32>
    %3 = vector.shape_cast %2 : vector<1x2x128xf32> to vector<2x128xf32>
    %c0_5 = arith.constant 0 : index
    %c0_6 = arith.constant 0 : index
    %c0_7 = arith.constant 0 : index
    %4 = vector.load %arg3[%c0_5, %c0_6, %c0_7] : memref<1x10x128xf32, #tpu.memory_space<vmem>>, vector<1x10x128xf32>
    %5 = vector.shape_cast %4 : vector<1x10x128xf32> to vector<10x128xf32>
    %c0_8 = arith.constant 0 : index
    %c0_9 = arith.constant 0 : index
    %c0_10 = arith.constant 0 : index
    %6 = vector.load %arg4[%c0_8, %c0_9, %c0_10] : memref<1x4x128xf32, #tpu.memory_space<vmem>>, vector<1x4x128xf32>
    %7 = vector.shape_cast %6 : vector<1x4x128xf32> to vector<4x128xf32>
    %c0_11 = arith.constant 0 : index
    %c0_12 = arith.constant 0 : index
    %c0_13 = arith.constant 0 : index
    %8 = vector.load %arg5[%c0_11, %c0_12, %c0_13] : memref<1x10x128xf32, #tpu.memory_space<vmem>>, vector<1x10x128xf32>
    %9 = vector.shape_cast %8 : vector<1x10x128xf32> to vector<10x128xf32>
    %c0_14 = arith.constant 0 : index
    %c0_15 = arith.constant 0 : index
    %c0_16 = arith.constant 0 : index
    %10 = vector.load %arg6[%c0_14, %c0_15, %c0_16] : memref<1x1x128xi32, #tpu.memory_space<vmem>>, vector<1x1x128xi32>
    %11 = vector.shape_cast %10 : vector<1x1x128xi32> to vector<1x128xi32>
    %c0_i32 = arith.constant 0 : i32
    %12 = vector.broadcast %c0_i32 : i32 to vector<1x128xi32>
    %13 = arith.cmpi sgt, %11, %12 : vector<1x128xi32>
    %14 = arith.extui %13 : vector<1x128xi1> to vector<1x128xi32>
    %15 = arith.sitofp %14 : vector<1x128xi32> to vector<1x128xf32>
    %16 = vector.shape_cast %15 : vector<1x128xf32> to vector<1x1x128xf32>
    %cst = arith.constant dense<0.000000e+00> : vector<1xf32>
    %17 = vector.multi_reduction <add>, %16, %cst [1, 2] : vector<1x1x128xf32> to vector<1xf32>
    %18 = vector.shape_cast %17 : vector<1xf32> to vector<1x1x1xf32>
    %19 = vector.extract %18[0, 0, 0] : f32 from vector<1x1x1xf32>
    %20 = arith.subf %5, %9 : vector<10x128xf32>
    %21 = math.absf %20 : vector<10x128xf32>
    %cst_17 = arith.constant 1.000000e+00 : f32
    %22 = vector.broadcast %cst_17 : f32 to vector<10x128xf32>
    %23 = arith.cmpf olt, %21, %22 : vector<10x128xf32>
    %cst_18 = arith.constant 5.000000e-01 : f32
    %24 = vector.broadcast %cst_18 : f32 to vector<10x128xf32>
    %25 = arith.mulf %24, %20 : vector<10x128xf32>
    %26 = arith.mulf %25, %20 : vector<10x128xf32>
    %cst_19 = arith.constant 5.000000e-01 : f32
    %27 = vector.broadcast %cst_19 : f32 to vector<10x128xf32>
    %28 = arith.subf %21, %27 : vector<10x128xf32>
    %29 = arith.select %23, %26, %28 : vector<10x128xi1>, vector<10x128xf32>
    %cst_20 = arith.constant 0.000000e+00 : f32
    %30 = vector.shape_cast %13 : vector<1x128xi1> to vector<1x128xi1>
    %31 = vector.broadcast %30 : vector<1x128xi1> to vector<10x128xi1>
    %32 = vector.broadcast %cst_20 : f32 to vector<10x128xf32>
    %33 = arith.select %31, %29, %32 : vector<10x128xi1>, vector<10x128xf32>
    %34 = vector.shape_cast %33 : vector<10x128xf32> to vector<1x10x128xf32>
    %cst_21 = arith.constant dense<0.000000e+00> : vector<1xf32>
    %35 = vector.multi_reduction <add>, %34, %cst_21 [1, 2] : vector<1x10x128xf32> to vector<1xf32>
    %36 = vector.shape_cast %35 : vector<1xf32> to vector<1x1x1xf32>
    %37 = vector.extract %36[0, 0, 0] : f32 from vector<1x1x1xf32>
    %c0_i32_22 = arith.constant 0 : i32
    %38 = vector.broadcast %c0_i32_22 : i32 to vector<1x128xi32>
    %39 = arith.cmpi ne, %11, %38 : vector<1x128xi32>
    %40 = arith.extui %39 : vector<1x128xi1> to vector<1x128xi32>
    %41 = arith.sitofp %40 : vector<1x128xi32> to vector<1x128xf32>
    %42 = vector.shape_cast %41 : vector<1x128xf32> to vector<1x1x128xf32>
    %cst_23 = arith.constant dense<0.000000e+00> : vector<1xf32>
    %43 = vector.multi_reduction <add>, %42, %cst_23 [1, 2] : vector<1x1x128xf32> to vector<1xf32>
    %44 = vector.shape_cast %43 : vector<1xf32> to vector<1x1x1xf32>
    %45 = vector.extract %44[0, 0, 0] : f32 from vector<1x1x1xf32>
    %46 = arith.subf %1, %7 : vector<4x128xf32>
    %47 = math.absf %46 : vector<4x128xf32>
    %cst_24 = arith.constant 1.000000e+00 : f32
    %48 = vector.broadcast %cst_24 : f32 to vector<4x128xf32>
    %49 = arith.cmpf olt, %47, %48 : vector<4x128xf32>
    %cst_25 = arith.constant 5.000000e-01 : f32
    %50 = vector.broadcast %cst_25 : f32 to vector<4x128xf32>
    %51 = arith.mulf %50, %46 : vector<4x128xf32>
    %52 = arith.mulf %51, %46 : vector<4x128xf32>
    %cst_26 = arith.constant 5.000000e-01 : f32
    %53 = vector.broadcast %cst_26 : f32 to vector<4x128xf32>
    %54 = arith.subf %47, %53 : vector<4x128xf32>
    %55 = arith.select %49, %52, %54 : vector<4x128xi1>, vector<4x128xf32>
    %cst_27 = arith.constant 0.000000e+00 : f32
    %56 = vector.shape_cast %39 : vector<1x128xi1> to vector<1x128xi1>
    %57 = vector.broadcast %56 : vector<1x128xi1> to vector<4x128xi1>
    %58 = vector.broadcast %cst_27 : f32 to vector<4x128xf32>
    %59 = arith.select %57, %55, %58 : vector<4x128xi1>, vector<4x128xf32>
    %60 = vector.shape_cast %59 : vector<4x128xf32> to vector<1x4x128xf32>
    %cst_28 = arith.constant dense<0.000000e+00> : vector<1xf32>
    %61 = vector.multi_reduction <add>, %60, %cst_28 [1, 2] : vector<1x4x128xf32> to vector<1xf32>
    %62 = vector.shape_cast %61 : vector<1xf32> to vector<1x1x1xf32>
    %63 = vector.extract %62[0, 0, 0] : f32 from vector<1x1x1xf32>
    %c1_i32 = arith.constant 1 : i32
    %64 = vector.broadcast %c1_i32 : i32 to vector<1x128xi32>
    %65 = arith.select %39, %64, %11 : vector<1x128xi1>, vector<1x128xi32>
    %66 = vector.extract_strided_slice %3 {offsets = [0, 0], sizes = [1, 128], strides = [1, 1]} : vector<2x128xf32> to vector<1x128xf32>
    %67 = vector.extract_strided_slice %3 {offsets = [1, 0], sizes = [1, 128], strides = [1, 1]} : vector<2x128xf32> to vector<1x128xf32>
    %68 = arith.maximumf %66, %67 : vector<1x128xf32>
    %69 = arith.subf %66, %67 : vector<1x128xf32>
    %70 = math.absf %69 : vector<1x128xf32>
    %cst_29 = arith.constant 0.000000e+00 : f32
    %71 = vector.broadcast %cst_29 : f32 to vector<1x128xf32>
    %72 = arith.subf %71, %70 : vector<1x128xf32>
    %73 = math.exp %72 : vector<1x128xf32>
    %cst_30 = arith.constant 1.000000e+00 : f32
    %74 = vector.broadcast %cst_30 : f32 to vector<1x128xf32>
    %75 = arith.addf %74, %73 : vector<1x128xf32>
    %76 = math.log %75 : vector<1x128xf32>
    %77 = arith.addf %68, %76 : vector<1x128xf32>
    %c1_i32_31 = arith.constant 1 : i32
    %78 = vector.broadcast %c1_i32_31 : i32 to vector<1x128xi32>
    %79 = arith.cmpi eq, %65, %78 : vector<1x128xi32>
    %80 = arith.select %79, %67, %66 : vector<1x128xi1>, vector<1x128xf32>
    %81 = arith.subf %77, %80 : vector<1x128xf32>
    %cst_32 = arith.constant 0.000000e+00 : f32
    %82 = vector.broadcast %cst_32 : f32 to vector<1x128xf32>
    %83 = arith.select %39, %82, %81 : vector<1x128xi1>, vector<1x128xf32>
    %cst_33 = arith.constant 7.000000e+00 : f32
    %84 = arith.mulf %cst_33, %45 : f32
    %cst_34 = arith.constant 1.270000e+02 : f32
    %85 = arith.minimumf %84, %cst_34 : f32
    %86 = vector.shape_cast %83 : vector<1x128xf32> to vector<1x128x1xf32>
    %87 = vector.shape_cast %83 : vector<1x128xf32> to vector<1x1x128xf32>
    %88 = vector.broadcast %87 : vector<1x1x128xf32> to vector<1x128x128xf32>
    %89 = vector.broadcast %86 : vector<1x128x1xf32> to vector<1x128x128xf32>
    %90 = arith.cmpf ogt, %88, %89 : vector<1x128x128xf32>
    %91 = arith.extui %90 : vector<1x128x128xi1> to vector<1x128x128xi32>
    %92 = arith.sitofp %91 : vector<1x128x128xi32> to vector<1x128x128xf32>
    %cst_35 = arith.constant dense<0.000000e+00> : vector<1x128xf32>
    %93 = vector.multi_reduction <add>, %92, %cst_35 [2] : vector<1x128x128xf32> to vector<1x128xf32>
    %94 = vector.broadcast %87 : vector<1x1x128xf32> to vector<1x128x128xf32>
    %95 = vector.broadcast %86 : vector<1x128x1xf32> to vector<1x128x128xf32>
    %96 = arith.cmpf oge, %94, %95 : vector<1x128x128xf32>
    %97 = arith.extui %96 : vector<1x128x128xi1> to vector<1x128x128xi32>
    %98 = arith.sitofp %97 : vector<1x128x128xi32> to vector<1x128x128xf32>
    %cst_36 = arith.constant dense<0.000000e+00> : vector<1x128xf32>
    %99 = vector.multi_reduction <add>, %98, %cst_36 [2] : vector<1x128x128xf32> to vector<1x128xf32>
    %100 = vector.broadcast %85 : f32 to vector<1x128xf32>
    %101 = arith.cmpf olt, %93, %100 : vector<1x128xf32>
    %102 = vector.broadcast %85 : f32 to vector<1x128xf32>
    %103 = arith.cmpf ole, %102, %99 : vector<1x128xf32>
    %104 = arith.andi %101, %103 : vector<1x128xi1>
    %cst_37 = arith.constant 0xFF800000 : f32
    %105 = vector.broadcast %cst_37 : f32 to vector<1x128xf32>
    %106 = arith.select %104, %83, %105 : vector<1x128xi1>, vector<1x128xf32>
    %107 = vector.shape_cast %106 : vector<1x128xf32> to vector<1x1x128xf32>
    %cst_38 = arith.constant dense<0xFF800000> : vector<1xf32>
    %108 = vector.multi_reduction <maximumf>, %107, %cst_38 [1, 2] : vector<1x1x128xf32> to vector<1xf32>
    %109 = vector.shape_cast %108 : vector<1xf32> to vector<1x1x1xf32>
    %110 = vector.extract %109[0, 0, 0] : f32 from vector<1x1x1xf32>
    %111 = vector.broadcast %110 : f32 to vector<1x128xf32>
    %112 = arith.cmpf ogt, %83, %111 : vector<1x128xf32>
    %113 = arith.extui %112 : vector<1x128xi1> to vector<1x128xi32>
    %114 = arith.sitofp %113 : vector<1x128xi32> to vector<1x128xf32>
    %115 = vector.shape_cast %114 : vector<1x128xf32> to vector<1x1x128xf32>
    %cst_39 = arith.constant dense<0.000000e+00> : vector<1xf32>
    %116 = vector.multi_reduction <add>, %115, %cst_39 [1, 2] : vector<1x1x128xf32> to vector<1xf32>
    %117 = vector.shape_cast %116 : vector<1xf32> to vector<1x1x1xf32>
    %118 = vector.extract %117[0, 0, 0] : f32 from vector<1x1x1xf32>
    %cst_40 = arith.constant 0.000000e+00 : f32
    %119 = vector.broadcast %cst_40 : f32 to vector<1x128xf32>
    %120 = arith.select %112, %83, %119 : vector<1x128xi1>, vector<1x128xf32>
    %121 = vector.shape_cast %120 : vector<1x128xf32> to vector<1x1x128xf32>
    %cst_41 = arith.constant dense<0.000000e+00> : vector<1xf32>
    %122 = vector.multi_reduction <add>, %121, %cst_41 [1, 2] : vector<1x1x128xf32> to vector<1xf32>
    %123 = vector.shape_cast %122 : vector<1xf32> to vector<1x1x1xf32>
    %124 = vector.extract %123[0, 0, 0] : f32 from vector<1x1x1xf32>
    %cst_42 = arith.constant 0.000000e+00 : f32
    %125 = arith.cmpf ogt, %85, %cst_42 : f32
    %126 = arith.subf %85, %118 : f32
    %127 = arith.mulf %126, %110 : f32
    %128 = arith.addf %124, %127 : f32
    %cst_43 = arith.constant 0.000000e+00 : f32
    %129 = arith.select %125, %128, %cst_43 : f32
    %cst_44 = arith.constant 0.000000e+00 : f32
    %130 = vector.broadcast %cst_44 : f32 to vector<1x128xf32>
    %131 = arith.select %39, %81, %130 : vector<1x128xi1>, vector<1x128xf32>
    %132 = vector.shape_cast %131 : vector<1x128xf32> to vector<1x1x128xf32>
    %cst_45 = arith.constant dense<0.000000e+00> : vector<1xf32>
    %133 = vector.multi_reduction <add>, %132, %cst_45 [1, 2] : vector<1x1x128xf32> to vector<1xf32>
    %134 = vector.shape_cast %133 : vector<1xf32> to vector<1x1x1xf32>
    %135 = vector.extract %134[0, 0, 0] : f32 from vector<1x1x1xf32>
    %136 = arith.addf %135, %129 : f32
    %137 = tpu.iota {dimensions = array<i32: 1>} : vector<1x128xi32>
    %c0_i32_46 = arith.constant 0 : i32
    %138 = vector.broadcast %c0_i32_46 : i32 to vector<1x128xi32>
    %139 = arith.cmpi eq, %137, %138 : vector<1x128xi32>
    %c1_i32_47 = arith.constant 1 : i32
    %140 = vector.broadcast %c1_i32_47 : i32 to vector<1x128xi32>
    %141 = arith.cmpi eq, %137, %140 : vector<1x128xi32>
    %c2_i32 = arith.constant 2 : i32
    %142 = vector.broadcast %c2_i32 : i32 to vector<1x128xi32>
    %143 = arith.cmpi eq, %137, %142 : vector<1x128xi32>
    %c3_i32 = arith.constant 3 : i32
    %144 = vector.broadcast %c3_i32 : i32 to vector<1x128xi32>
    %145 = arith.cmpi eq, %137, %144 : vector<1x128xi32>
    %c4_i32 = arith.constant 4 : i32
    %146 = vector.broadcast %c4_i32 : i32 to vector<1x128xi32>
    %147 = arith.cmpi eq, %137, %146 : vector<1x128xi32>
    %cst_48 = arith.constant 0.000000e+00 : f32
    %148 = vector.broadcast %19 : f32 to vector<1x128xf32>
    %149 = vector.broadcast %cst_48 : f32 to vector<1x128xf32>
    %150 = arith.select %147, %148, %149 : vector<1x128xi1>, vector<1x128xf32>
    %151 = vector.broadcast %45 : f32 to vector<1x128xf32>
    %152 = arith.select %145, %151, %150 : vector<1x128xi1>, vector<1x128xf32>
    %153 = vector.broadcast %37 : f32 to vector<1x128xf32>
    %154 = arith.select %143, %153, %152 : vector<1x128xi1>, vector<1x128xf32>
    %155 = vector.broadcast %136 : f32 to vector<1x128xf32>
    %156 = arith.select %141, %155, %154 : vector<1x128xi1>, vector<1x128xf32>
    %157 = vector.broadcast %63 : f32 to vector<1x128xf32>
    %158 = arith.select %139, %157, %156 : vector<1x128xi1>, vector<1x128xf32>
    %159 = vector.shape_cast %158 : vector<1x128xf32> to vector<1x1x128xf32>
    %c0_49 = arith.constant 0 : index
    %c0_50 = arith.constant 0 : index
    %c0_51 = arith.constant 0 : index
    %160 = vector.load %arg7[%c0_49, %c0_50, %c0_51] : memref<1x1x128xf32, #tpu.memory_space<vmem>>, vector<1x1x128xf32>
    tpu.vector_store %arg7[%c0_49, %c0_50, %c0_51], %159 {strides = array<i32>} : memref<1x1x128xf32, #tpu.memory_space<vmem>>, vector<1x1x128xf32>,
    return
  }
  func.func @transform_0(%arg0: i32) -> (i32, i32, i32) {
    %c0_i32 = arith.constant 0 : i32
    %c0_i32_0 = arith.constant 0 : i32
    %c0_i32_1 = arith.constant 0 : i32
    return %arg0, %c0_i32, %c0_i32_0 : i32, i32, i32
  }
  func.func @transform_1(%arg0: i32) -> (i32, i32, i32) {
    %c0_i32 = arith.constant 0 : i32
    %c0_i32_0 = arith.constant 0 : i32
    %c0_i32_1 = arith.constant 0 : i32
    return %arg0, %c0_i32, %c0_i32_0 : i32, i32, i32
  }
  func.func @transform_2(%arg0: i32) -> (i32, i32, i32) {
    %c0_i32 = arith.constant 0 : i32
    %c0_i32_0 = arith.constant 0 : i32
    %c0_i32_1 = arith.constant 0 : i32
    return %arg0, %c0_i32, %c0_i32_0 : i32, i32, i32
  }
  func.func @transform_3(%arg0: i32) -> (i32, i32, i32) {
    %c0_i32 = arith.constant 0 : i32
    %c0_i32_0 = arith.constant 0 : i32
    %c0_i32_1 = arith.constant 0 : i32
    return %arg0, %c0_i32, %c0_i32_0 : i32, i32, i32
  }
  func.func @transform_4(%arg0: i32) -> (i32, i32, i32) {
    %c0_i32 = arith.constant 0 : i32
    %c0_i32_0 = arith.constant 0 : i32
    %c0_i32_1 = arith.constant 0 : i32
    return %arg0, %c0_i32, %c0_i32_0 : i32, i32, i32
  }
  func.func @transform_5(%arg0: i32) -> (i32, i32, i32) {
    %c0_i32 = arith.constant 0 : i32
    %c0_i32_0 = arith.constant 0 : i32
    %c0_i32_1 = arith.constant 0 : i32
    return %arg0, %c0_i32, %c0_i32_0 : i32, i32, i32
  }
  func.func @transform_6(%arg0: i32) -> (i32, i32, i32) {
    %c0_i32 = arith.constant 0 : i32
    %c0_i32_0 = arith.constant 0 : i32
    %c0_i32_1 = arith.constant 0 : i32
    return %arg0, %c0_i32, %c0_i32_0 : i32, i32, i32
  }
}

</mosaic_0001>

<bundles_post_ra>
// kernel: _multibox_loss_jit.1
= control target key start
LH: loop header
LB: loop body
LE: loop exit
PB: predicated region body
PF: predicated region fallthrough
CT: control target
= control target key end

     0   :  { %s1174_s21 = smov 0   ;;  %s1549_s0 = inlined_call_operand.vmem [shape: f32[2,4,128], index: 0, kind: input, shape index: {}]   ;;  %s1550_s1 = inlined_call_operand.vmem [shape: f32[2,2,128], index: 1, kind: input, shape index: {}]   ;;  %s1551_s2 = inlined_call_operand.vmem [shape: f32[2,10,128], index: 2, kind: input, shape index: {}]   ;;  %s1552_s3 = inlined_call_operand.vmem [shape: f32[2,4,128], index: 3, kind: input, shape index: {}]   ;;  %s1553_s4 = inlined_call_operand.vmem [shape: f32[2,10,128], index: 4, kind: input, shape index: {}]   ;;  %s1554_s5 = inlined_call_operand.vmem [shape: s32[2,1,128], index: 5, kind: input, shape index: {}]   ;;  %s1555_s6 = inlined_call_operand.vmem [shape: f32[2,1,128], index: 6, kind: output, shape index: {}]  }
   0x1 LB: > { %s1041_s22 = sadd.s32 4294967295, %s1133_s21   ;;  %p1045_p0 = scmp.ge.s32.totalorder %s1133_s21, 1  ;;  %s1133_s21 = sphi %s1174_s21, %s16_s21  }
   0x2   : > { %p257_p1 = scmp.lt.s32.totalorder %s1133_s21, 3 }
   0x4   : > { %p258_p2 = pnand %p1045_p0, %p257_p1 }
   0x5   : > { %p305_p3 = scmp.lt.s32.totalorder (!%p258_p2), %s1041_s22, 1  ;;  %v369_v0 = vlaneseq (!%p258_p2)  ;;  %vm344_vm0 = vcmask (!%p258_p2), 1040384   ;;  %v1135_v5 = vmov (!%p258_p2), 0.0   ;;  %v1136_v8 = vmov (!%p258_p2), 0  }
   0x6   : > { %261 = sbr.rel (%p258_p2) target bundleno = 703 (0x2bf), region = 44  ;;  %vm376_vm6 = vcmask (!%p258_p2), 1041408   ;;  %v1137_v40 = vmov (!%p258_p2), 1966171168   ;;  %vm414_vm10 = vcmask (!%p258_p2), 1043456  }
   0x7   : > { %v370_v1 = vshrl.u32 (!%p258_p2), %v369_v0, 7  ;;  %v441_v41 = vunpack.c.l.s4 (!%p258_p2), %v1137_v40 }
   0x9   : > { %v1192_v3 = vsub.s32 (!%p258_p2), 0, %v370_v1  ;;  %v442_v42 = vunpack.c.0.s8 (!%p258_p2), %v441_v41 }
   0xb   : > { %v445_v43 = vsub.s32 (!%p258_p2), %v442_v42, %v370_v1 }
   0xd   : > { %s1573_s22 = smov (!%p305_p3, %s1041_s22), 1 }
   0xe   : > { %s329_s25 = scalar_lea.vmem %s1554_s5, %s1573_s22  ;;  %s1047_s26 = sshll.u32 %s1573_s22, 1 }
   0xf   : > { %v1190_v2 = vld [vmem:[%s329_s25] sm:$0x1]  ;;  %s312_s29 = scalar_lea.vmem %s1550_s1, %s1047_s26  ;;  %s1093_s30 = sshll.u32 %s1573_s22, 4 }
  0x10   : > { %vm388_vm1 = vcmp.ne.s32.totalorder %v1190_v2, 0  ;;  %vm341_vm2 = vcmp.gt.s32.totalorder %v1190_v2, 0  ;;  %v334_v4 = vld [vmem:[%s312_s29] sm:$0x3]  ;;  %s317_s9 = scalar_lea.vmem %s1551_s2, %s1093_s30  ;;  %s326_s12 = scalar_lea.vmem %s1553_s4, %s1093_s30 }
  0x11   : > { %v1056_v6 = vsel %vm388_vm1, 1.0, %v1135_v5  ;;  %v1053_v7 = vsel %vm341_vm2, 1.0, %v1135_v5  ;;  %v342_v9 = vsel %vm341_vm2, 1, %v1136_v8  ;;  %v335_v10 = vld [vmem:[%s317_s9] sm:$0xff]  ;;  %v336_v14 = vld [vmem:[%s317_s9 + $0x8] sm:$0x3]  ;;  %v446_v46 = vrot.slane %v334_v4, %v445_v43  ;;  %s332_s15 = scalar_lea.vmem %s1555_s6, %s1573_s22 }
  0x12   : > { %v338_v11 = vld [vmem:[%s326_s12] sm:$0xff]  ;;  %v391_v12 = vsel %vm344_vm0, %v1056_v6, 0.0  ;;  %v345_v13 = vsel %vm344_vm0, %v1053_v7, 0.0  ;;  %v372_v15 = vrot.slane %v342_v9, %v1192_v3  ;;  %v427_v16 = vrot.slane %v334_v4, 1  ;;  %v339_v17 = vld [vmem:[%s326_s12 + $0x8] sm:$0x3] }
  0x13   : > { %392 = vadd.xlane.f32.xlu1 %v391_v12  ;;  %346 = vadd.xlane.f32.xlu0 %v345_v13  ;;  %v355_v18 = vsub.f32 %v335_v10, %v338_v11  ;;  %v1215_v19 = vsel %vm388_vm1, 1, %v1136_v8  ;;  %v356_v20 = vsub.f32 %v336_v14, %v339_v17  ;;  %v447_v47 = vcombine.high %v446_v46, %v446_v46  ;;  %s1046_s13 = sshll.u32 %s1573_s22, 2  ;;  %s1138_s26 = smov 127.0  }
  0x14   : > { %v411_v21 = vrot.slane %v1215_v19, %v1192_v3  ;;  %v430_v22 = vsub.f32 %v334_v4, %v427_v16  ;;  %vm373_vm4 = vcmp.eq.s32.totalorder %v372_v15, 1  ;;  %v425_v48 = vsel %vm388_vm1, 1, %v1190_v2  ;;  %s308_s16 = scalar_lea.vmem %s1549_s0, %s1046_s13  ;;  %s321_s19 = scalar_lea.vmem %s1552_s3, %s1046_s13 }
  0x15   : > { %v357_v23 = vand.u32 2147483647, %v355_v18  ;;  %v358_v24 = vand.u32 2147483647, %v356_v20  ;;  %v361_v25 = vmul.f32 0.5, %v355_v18  ;;  %v362_v26 = vmul.f32 0.5, %v356_v20 }
  0x16   : > { %v431_v27 = vand.u32 2147483647, %v430_v22  ;;  %v454_v49 = vrot.slane %v447_v47, %v445_v43  ;;  %vm439_vm7 = vcmp.eq.s32.totalorder %v425_v48, 1  ;;  %v429_v50 = vmax.f32 %v334_v4, %v427_v16  ;;  %v333_v58 = vld [vmem:[%s308_s16] sm:$0xf] }
  0x17   : > { %vm359_vm3 = vcmp.lt.f32.partialorder %v357_v23, 1.0  ;;  %v1054_v28 = vadd.f32 -0.5, %v357_v23  ;;  %vm360_vm5 = vcmp.lt.f32.partialorder %v358_v24, 1.0  ;;  %v363_v29 = vmul.f32 %v361_v25, %v355_v18  ;;  %v337_v59 = vld [vmem:[%s321_s19] sm:$0xf] }
  0x18   : > { %v364_v30 = vmul.f32 %v362_v26, %v356_v20  ;;  %v1055_v31 = vadd.f32 -0.5, %v358_v24  ;;  %v432_v32 = vsub.f32 0.0, %v431_v27  ;;  %v456_v53 = vsel %vm439_vm7, %v454_v49, %v334_v4 }
  0x19   : > { %v367_v33 = vsel %vm359_vm3, %v363_v29, %v1054_v28  ;;  %v401_v60 = vsub.f32 %v333_v58, %v337_v59  ;;  %vm412_vm9 = vcmp.eq.s32.totalorder %v411_v21, 1 }
  0x1a   : > { %v368_v34 = vsel %vm360_vm5, %v364_v30, %v1055_v31  ;;  %v433_v35 = vmul.f32 1.442695, %v432_v32  ;;  %v374_v36 = vsel %vm373_vm4, %v367_v33, 0.0 }
  0x1b   : > { %v375_v37 = vsel %vm373_vm4, %v368_v34, 0.0  ;;  %v402_v61 = vand.u32 2147483647, %v401_v60  ;;  %v404_v62 = vmul.f32 0.5, %v401_v60 }
  0x1c   : > { %v377_v38 = vsel %vm376_vm6, %v375_v37, 0.0  ;;  %1123 = vpow2.f32 %v433_v35 }
  0x1d   : > { %v378_v39 = vadd.f32 %v377_v38, %v374_v36  ;;  %v405_v63 = vmul.f32 %v404_v62, %v401_v60  ;;  %v1057_v1 = vadd.f32 -0.5, %v402_v61  ;;  %vm403_vm8 = vcmp.lt.f32.partialorder %v402_v61, 1.0 }
  0x1e   : > { %v1302_v62 = vand.u32 127, %v369_v0 }
  0x1f   : > { %379 = vadd.xlane.f32.xlu0 %v378_v39  ;;  %v407_v4 = vsel %vm403_vm8, %v405_v63, %v1057_v1 }
  0x20   : > { %v413_v6 = vsel %vm412_vm9, %v407_v4, 0.0 }
  0x21   : > { %v415_v7 = vsel %vm414_vm10, %v413_v6, 0.0 }
  0x26   : > { %v1124_v44 = vpop.eup %1123 }
  0x27   : > { %v435_v45 = vadd.f32 1.0, %v1124_v44 }
  0x29   : > { %1125 = vlog2.f32 %v435_v45 }
  0x33   : > { %v1126_v51 = vpop.eup %1125 }
  0x34   : > { %v437_v52 = vmul.f32 0.6931472, %v1126_v51 }
  0x36   : > { %v438_v54 = vadd.f32 %v437_v52, %v429_v50 }
  0x38   : > { %v1222_v55 = vsub.f32 %v438_v54, %v456_v53 }
  0x3a   : > { %v1227_v56 = vsel %vm388_vm1, 0.0, %v1222_v55 }
  0x3b   : > { %v1231_v57 = vrot.slane %v1227_v56, %v1192_v3 }
  0x3d   : > { %470 = vbcast.lane.b32.xlu0 %v1231_v57, 264  ;;  %466 = vbcast.lane.b32.xlu1 %v1231_v57, 256 }
  0x41   : > { %474 = vbcast.lane.b32.xlu1 %v1231_v57, 272  ;;  %486 = vbcast.lane.b32.xlu0 %v1231_v57, 296 }
  0x45   : > { %478 = vbcast.lane.b32.xlu1 %v1231_v57, 280  ;;  %494 = vbcast.lane.b32.xlu0 %v1231_v57, 312 }
  0x49   : > { %482 = vbcast.lane.b32.xlu1 %v1231_v57, 288  ;;  %502 = vbcast.lane.b32.xlu0 %v1231_v57, 328 }
  0x4d   : > { %490 = vbcast.lane.b32.xlu1 %v1231_v57, 304  ;;  %510 = vbcast.lane.b32.xlu0 %v1231_v57, 344 }
  0x51   : > { %498 = vbcast.lane.b32.xlu1 %v1231_v57, 320  ;;  %518 = vbcast.lane.b32.xlu0 %v1231_v57, 360 }
  0x55   : > { %506 = vbcast.lane.b32.xlu1 %v1231_v57, 336  ;;  %526 = vbcast.lane.b32.xlu0 %v1231_v57, 376 }
  0x59   : > { %514 = vbcast.lane.b32.xlu1 %v1231_v57, 352  ;;  %744 = vbcast.lane.b32.xlu0 %v1231_v57, 256 }
  0x5d   : > { %522 = vbcast.lane.b32.xlu1 %v1231_v57, 368 }
  0x81   : > { %416 = vadd.xlane.f32.xlu1 %v415_v7 }
  0x92   : > { %748 = vbcast.lane.b32.xlu1 %v1231_v57, 264 }
  0x96   : > { %752 = vbcast.lane.b32.xlu1 %v1231_v57, 272 }
  0xa0   : > { %v347_v8 = vpop.xlane.xlu0 %346  ;;  %v393_v9 = vpop.xlane.xlu1 %392 }
  0xa1   : > { %v348_v10 = vrot.slane %v347_v8, 4  ;;  %v394_v12 = vrot.slane %v393_v9, 4 }
  0xa3   : > { %v349_v11 = vadd.f32 %v348_v10, %v347_v8  ;;  %v395_v15 = vadd.f32 %v394_v12, %v393_v9 }
  0xa5   : > { %v350_v13 = vrot.slane %v349_v11, 2  ;;  %v396_v3 = vrot.slane %v395_v15, 2 }
  0xa7   : > { %v351_v14 = vadd.f32 %v350_v13, %v349_v11  ;;  %v397_v23 = vadd.f32 %v396_v3, %v395_v15 }
  0xa9   : > { %v352_v16 = vrot.slane %v351_v14, 1  ;;  %v398_v28 = vrot.slane %v397_v23, 1 }
  0xab   : > { %v353_v17 = vadd.f32 %v352_v16, %v351_v14  ;;  %v399_v33 = vadd.f32 %v398_v28, %v397_v23 }
  0xac   : > { %v380_v18 = vpop.xlane.xlu0 %379 }
  0xad   : > { %v381_v19 = vrot.slane %v380_v18, 4  ;;  %1095 = vpush %v353_v17 }
  0xaf   : > { %v382_v20 = vadd.f32 %v381_v19, %v380_v18  ;;  %v467_v22 = vpop.permute.xlu1 %466 }
  0xb0   : > { %v471_v21 = vpop.permute.xlu0 %470  ;;  %vm534_vm13 = vcmp.gt.f32.partialorder %v1231_v57, %v467_v22  ;;  %vm614_vm6 = vcmp.ge.f32.partialorder %v1231_v57, %v467_v22 }
  0xb1   : > { %v383_v24 = vrot.slane %v382_v20, 2  ;;  %vm535_vm11 = vcmp.gt.f32.partialorder %v1231_v57, %v471_v21  ;;  %v1058_v36 = vsel %vm534_vm13, 1.0, %v1135_v5  ;;  %vm615_vm5 = vcmp.ge.f32.partialorder %v1231_v57, %v471_v21 }
  0xb2   : > { %v1059_v25 = vsel %vm535_vm11, 1.0, %v1135_v5  ;;  %v1075_v44 = vsel %vm615_vm5, 1.0, %v1135_v5  ;;  %v1074_v45 = vsel %vm614_vm6, 1.0, %v1135_v5  ;;  %vm925_vm5 = vcmp.eq.s32.totalorder %v1302_v62, 4 }
  0xb3   : > { %584 = vadd.xlane.f32.xlu0 %v1059_v25  ;;  %v384_v26 = vadd.f32 %v383_v24, %v382_v20  ;;  %v475_v27 = vpop.permute.xlu1 %474 }
  0xb4   : > { %v487_v29 = vpop.permute.xlu0 %486  ;;  %vm536_vm12 = vcmp.gt.f32.partialorder %v1231_v57, %v475_v27  ;;  %vm616_vm8 = vcmp.ge.f32.partialorder %v1231_v57, %v475_v27 }
  0xb5   : > { %v385_v30 = vrot.slane %v384_v26, 1  ;;  %v1060_v31 = vsel %vm536_vm12, 1.0, %v1135_v5  ;;  %vm539_vm15 = vcmp.gt.f32.partialorder %v1231_v57, %v487_v29  ;;  %v1076_v47 = vsel %vm616_vm8, 1.0, %v1135_v5 }
  0xb6   : > { %v1063_v39 = vsel %vm539_vm15, 1.0, %v1135_v5  ;;  %vm619_vm9 = vcmp.ge.f32.partialorder %v1231_v57, %v487_v29 }
  0xb7   : > { %586 = vadd.xlane.f32.xlu0 %v1060_v31  ;;  %v386_v32 = vadd.f32 %v385_v30, %v384_v26  ;;  %v479_v34 = vpop.permute.xlu1 %478  ;;  %v1079_v50 = vsel %vm619_vm9, 1.0, %v1135_v5 }
  0xb8   : > { %vm537_vm14 = vcmp.gt.f32.partialorder %v1231_v57, %v479_v34  ;;  %v495_v37 = vpop.permute.xlu0 %494  ;;  %vm617_vm7 = vcmp.ge.f32.partialorder %v1231_v57, %v479_v34 }
  0xb9   : > { %1097 = vpush %v386_v32  ;;  %v1061_v35 = vsel %vm537_vm14, 1.0, %v1135_v5  ;;  %vm541_vm3 = vcmp.gt.f32.partialorder %v1231_v57, %v495_v37  ;;  %v1077_v46 = vsel %vm617_vm7, 1.0, %v1135_v5  ;;  %vm621_vm11 = vcmp.ge.f32.partialorder %v1231_v57, %v495_v37 }
  0xba   : > { %1099 = vpush %v399_v33  ;;  %582 = vadd.xlane.f32.xlu1 %v1058_v36  ;;  %v1065_v42 = vsel %vm541_vm3, 1.0, %v1135_v5  ;;  %v1081_v52 = vsel %vm621_vm11, 1.0, %v1135_v5 }
  0xbb   : > { %588 = vadd.xlane.f32.xlu0 %v1061_v35  ;;  %v483_v38 = vpop.permute.xlu1 %482 }
  0xbc   : > { %vm538_vm2 = vcmp.gt.f32.partialorder %v1231_v57, %v483_v38  ;;  %vm618_vm10 = vcmp.ge.f32.partialorder %v1231_v57, %v483_v38  ;;  %v503_v48 = vpop.permute.xlu0 %502 }
  0xbd   : > { %v1062_v40 = vsel %vm538_vm2, 1.0, %v1135_v5  ;;  %v1078_v51 = vsel %vm618_vm10, 1.0, %v1135_v5  ;;  %vm543_vm13 = vcmp.gt.f32.partialorder %v1231_v57, %v503_v48  ;;  %vm623_vm3 = vcmp.ge.f32.partialorder %v1231_v57, %v503_v48 }
  0xbe   : > { %590 = vadd.xlane.f32.xlu1 %v1062_v40  ;;  %v1067_v59 = vsel %vm543_vm13, 1.0, %v1135_v5  ;;  %v1083_v6 = vsel %vm623_vm3, 1.0, %v1135_v5 }
  0xbf   : > { %592 = vadd.xlane.f32.xlu0 %v1063_v39  ;;  %v491_v41 = vpop.permute.xlu1 %490 }
  0xc0   : > { %vm540_vm4 = vcmp.gt.f32.partialorder %v1231_v57, %v491_v41  ;;  %vm620_vm12 = vcmp.ge.f32.partialorder %v1231_v57, %v491_v41  ;;  %v511_v54 = vpop.permute.xlu0 %510 }
  0xc1   : > { %v1064_v43 = vsel %vm540_vm4, 1.0, %v1135_v5  ;;  %v1080_v53 = vsel %vm620_vm12, 1.0, %v1135_v5  ;;  %vm545_vm15 = vcmp.gt.f32.partialorder %v1231_v57, %v511_v54  ;;  %vm625_vm6 = vcmp.ge.f32.partialorder %v1231_v57, %v511_v54 }
  0xc2   : > { %594 = vadd.xlane.f32.xlu1 %v1064_v43  ;;  %v1069_v61 = vsel %vm545_vm15, 1.0, %v1135_v5  ;;  %v1085_v9 = vsel %vm625_vm6, 1.0, %v1135_v5  ;;  %vm924_vm12 = vcmp.eq.s32.totalorder %v1302_v62, 3  ;;  %vm923_vm15 = vcmp.eq.s32.totalorder %v1302_v62, 2 }
  0xc3   : > { %596 = vadd.xlane.f32.xlu0 %v1065_v42  ;;  %v499_v49 = vpop.permute.xlu1 %498 }
  0xc4   : > { %vm542_vm14 = vcmp.gt.f32.partialorder %v1231_v57, %v499_v49  ;;  %vm622_vm4 = vcmp.ge.f32.partialorder %v1231_v57, %v499_v49  ;;  %v519_v1 = vpop.permute.xlu0 %518 }
  0xc5   : > { %v1066_v60 = vsel %vm542_vm14, 1.0, %v1135_v5  ;;  %v1082_v7 = vsel %vm622_vm4, 1.0, %v1135_v5  ;;  %vm547_vm8 = vcmp.gt.f32.partialorder %v1231_v57, %v519_v1  ;;  %vm627_vm13 = vcmp.ge.f32.partialorder %v1231_v57, %v519_v1 }
  0xc6   : > { %662 = vadd.xlane.f32.xlu1 %v1074_v45  ;;  %v1071_v13 = vsel %vm547_vm8, 1.0, %v1135_v5  ;;  %v1087_v19 = vsel %vm627_vm13, 1.0, %v1135_v5 }
  0xc7   : > { %664 = vadd.xlane.f32.xlu0 %v1075_v44  ;;  %v507_v58 = vpop.permute.xlu1 %506 }
  0xc8   : > { %vm544_vm2 = vcmp.gt.f32.partialorder %v1231_v57, %v507_v58  ;;  %vm624_vm7 = vcmp.ge.f32.partialorder %v1231_v57, %v507_v58  ;;  %v527_v11 = vpop.permute.xlu0 %526 }
  0xc9   : > { %v1068_v63 = vsel %vm544_vm2, 1.0, %v1135_v5  ;;  %v1084_v10 = vsel %vm624_vm7, 1.0, %v1135_v5  ;;  %vm549_vm10 = vcmp.gt.f32.partialorder %v1231_v57, %v527_v11  ;;  %vm629_vm2 = vcmp.ge.f32.partialorder %v1231_v57, %v527_v11 }
  0xca   : > { %666 = vadd.xlane.f32.xlu1 %v1076_v47  ;;  %v1073_v15 = vsel %vm549_vm10, 1.0, %v1135_v5  ;;  %v1089_v22 = vsel %vm629_vm2, 1.0, %v1135_v5 }
  0xcb   : > { %668 = vadd.xlane.f32.xlu0 %v1077_v46  ;;  %v515_v4 = vpop.permute.xlu1 %514 }
  0xcc   : > { %vm546_vm9 = vcmp.gt.f32.partialorder %v1231_v57, %v515_v4  ;;  %vm626_vm14 = vcmp.ge.f32.partialorder %v1231_v57, %v515_v4  ;;  %v745_v31 = vpop.permute.xlu0 %744 }
  0xcd   : > { %v1070_v14 = vsel %vm546_vm9, 1.0, %v1135_v5  ;;  %v1086_v20 = vsel %vm626_vm14, 1.0, %v1135_v5 }
  0xce   : > { %670 = vadd.xlane.f32.xlu1 %v1078_v51 }
  0xcf   : > { %672 = vadd.xlane.f32.xlu0 %v1079_v50  ;;  %v523_v12 = vpop.permute.xlu1 %522 }
  0xd0   : > { %vm548_vm11 = vcmp.gt.f32.partialorder %v1231_v57, %v523_v12  ;;  %vm628_vm3 = vcmp.ge.f32.partialorder %v1231_v57, %v523_v12 }
  0xd1   : > { %v1072_v16 = vsel %vm548_vm11, 1.0, %v1135_v5  ;;  %v1088_v23 = vsel %vm628_vm3, 1.0, %v1135_v5 }
  0xd2   : > { %674 = vadd.xlane.f32.xlu1 %v1080_v53 }
  0xd3   : > { %676 = vadd.xlane.f32.xlu0 %v1081_v52 }
  0xd6   : > { %598 = vadd.xlane.f32.xlu1 %v1066_v60 }
  0xd7   : > { %600 = vadd.xlane.f32.xlu0 %v1067_v59 }
  0xda   : > { %602 = vadd.xlane.f32.xlu1 %v1068_v63 }
  0xdb   : > { %604 = vadd.xlane.f32.xlu0 %v1069_v61 }
  0xde   : > { %s1096_s20 = spop %1095  ;;  %678 = vadd.xlane.f32.xlu1 %v1082_v7 }
  0xdf   : > { %680 = vadd.xlane.f32.xlu0 %v1083_v6  ;;  %v926_v0 = vstv %s1096_s20 }
  0xe0   : > { %v927_v8 = vsel %vm925_vm5, %v926_v0, 0.0 }
  0xe2   : > { %682 = vadd.xlane.f32.xlu1 %v1084_v10 }
  0xe3   : > { %684 = vadd.xlane.f32.xlu0 %v1085_v9 }
  0xe6   : > { %606 = vadd.xlane.f32.xlu1 %v1070_v14 }
  0xe7   : > { %608 = vadd.xlane.f32.xlu0 %v1071_v13 }
  0xea   : > { %s1098_s23 = spop %1097  ;;  %610 = vadd.xlane.f32.xlu1 %v1072_v16 }
  0xeb   : > { %v930_v17 = vstv %s1098_s23  ;;  %s1323_s24 = spop %1099  ;;  %612 = vadd.xlane.f32.xlu0 %v1073_v15 }
  0xec   : > { %v928_v3 = vstv %s1323_s24  ;;  %s459_s25 = smul.f32 7.0, %s1323_s24 }
  0xed   : > { %v929_v18 = vsel %vm924_vm12, %v928_v3, %v927_v8 }
  0xee   : > { %v1331_v21 = vsel %vm923_vm15, %v930_v17, %v929_v18  ;;  %686 = vadd.xlane.f32.xlu1 %v1086_v20  ;;  %s1359_s27 = smin.f32 %s1138_s26, %s459_s25  ;;  %vm838_vm15 = vcmask 7168  }
  0xef   : > { %688 = vadd.xlane.f32.xlu0 %v1087_v19  ;;  %p902_p4 = scmp.gt.f32.partialorder %s1359_s27, 0.0 }
  0xf2   : > { %690 = vadd.xlane.f32.xlu1 %v1088_v23 }
  0xf3   : > { %692 = vadd.xlane.f32.xlu0 %v1089_v22 }
 0x103   : > { %756 = vbcast.lane.b32.xlu1 %v1231_v57, 280 }
 0x107   : > { %764 = vbcast.lane.b32.xlu1 %v1231_v57, 296 }
 0x109   : > { %760 = vbcast.lane.b32.xlu0 %v1231_v57, 288 }
 0x10b   : > { %772 = vbcast.lane.b32.xlu1 %v1231_v57, 312 }
 0x10d   : > { %768 = vbcast.lane.b32.xlu0 %v1231_v57, 304 }
 0x10e   : > { %v417_v24 = vpop.xlane.xlu1 %416 }
 0x10f   : > { %v418_v25 = vrot.slane %v417_v24, 4  ;;  %780 = vbcast.lane.b32.xlu1 %v1231_v57, 328 }
 0x111   : > { %776 = vbcast.lane.b32.xlu0 %v1231_v57, 320  ;;  %v419_v26 = vadd.f32 %v418_v25, %v417_v24 }
 0x112   : > { %v1350_v32 = vpop.permute.xlu1 %748 }
 0x113   : > { %v420_v27 = vrot.slane %v419_v26, 2  ;;  %788 = vbcast.lane.b32.xlu1 %v1231_v57, 344 }
 0x115   : > { %784 = vbcast.lane.b32.xlu0 %v1231_v57, 336  ;;  %v421_v28 = vadd.f32 %v420_v27, %v419_v26 }
 0x116   : > { %v1352_v34 = vpop.permute.xlu1 %752 }
 0x117   : > { %v422_v29 = vrot.slane %v421_v28, 1  ;;  %796 = vbcast.lane.b32.xlu1 %v1231_v57, 360 }
 0x119   : > { %792 = vbcast.lane.b32.xlu0 %v1231_v57, 352  ;;  %v423_v30 = vadd.f32 %v422_v29, %v421_v28 }
 0x11b   : > { %1101 = vpush %v423_v30  ;;  %804 = vbcast.lane.b32.xlu1 %v1231_v57, 376 }
 0x11d   : > { %800 = vbcast.lane.b32.xlu0 %v1231_v57, 368  ;;  %v1362_v57 = vstv %s1359_s27 }
 0x140   : > { %v585_v33 = vpop.xlane.xlu0 %584 }
 0x141   : > { %vm696_vm4 = vcmp.lt.f32.partialorder %v585_v33, %v1362_v57 }
 0x144   : > { %v587_v35 = vpop.xlane.xlu0 %586 }
 0x145   : > { %vm697_vm10 = vcmp.lt.f32.partialorder %v587_v35, %v1362_v57 }
 0x147   : > { %v583_v37 = vpop.xlane.xlu1 %582 }
 0x148   : > { %v1354_v36 = vpop.xlane.xlu0 %588  ;;  %vm695_vm7 = vcmp.lt.f32.partialorder %v583_v37, %v1362_v57 }
 0x14b   : > { %v591_v39 = vpop.xlane.xlu1 %590 }
 0x14c   : > { %v593_v38 = vpop.xlane.xlu0 %592  ;;  %vm699_vm14 = vcmp.lt.f32.partialorder %v591_v39, %v1362_v57  ;;  %s1521_s28 = spop %1101 }
 0x14f   : > { %v595_v41 = vpop.xlane.xlu1 %594 }
 0x150   : > { %v1357_v40 = vpop.xlane.xlu0 %596 }
 0x153   : > { %v663_v43 = vpop.xlane.xlu1 %662 }
 0x154   : > { %v665_v42 = vpop.xlane.xlu0 %664  ;;  %vm711_vm6 = vcmp.le.f32.partialorder %v1362_v57, %v663_v43 }
 0x155   : > { %vm712_vm5 = vcmp.le.f32.partialorder %v1362_v57, %v665_v42  ;;  %vm1375_vm9 = vmand %vm695_vm7, %vm711_vm6  ;;  %vm701_vm6 = vcmp.lt.f32.partialorder %v595_v41, %v1362_v57 }
 0x156   : > { %vm1368_vm8 = vmand %vm696_vm4, %vm712_vm5  ;;  %v822_v47 = vsel %vm1375_vm9, %v745_v31, -inf  ;;  %vm700_vm5 = vcmp.lt.f32.partialorder %v593_v38, %v1362_v57 }
 0x157   : > { %v823_v45 = vsel %vm1368_vm8, %v1350_v32, -inf  ;;  %v667_v49 = vpop.xlane.xlu1 %666  ;;  %v1420_v3 = vsel %vm838_vm15, %v822_v47, -inf }
 0x158   : > { %v669_v48 = vpop.xlane.xlu0 %668  ;;  %vm713_vm11 = vcmp.le.f32.partialorder %v1362_v57, %v667_v49  ;;  %v840_v27 = vsel %vm838_vm15, %v823_v45, -inf }
 0x159   : > { %vm1383_vm12 = vmand %vm697_vm10, %vm713_vm11  ;;  %vm714_vm7 = vcmp.le.f32.partialorder %v1362_v57, %v669_v48  ;;  %vm698_vm10 = vcmp.lt.f32.partialorder %v1354_v36, %v1362_v57 }
 0x15a   : > { %v824_v51 = vsel %vm1383_vm12, %v1352_v34, -inf  ;;  %vm730_vm12 = vmand %vm698_vm10, %vm714_vm7 }
 0x15b   : > { %v671_v53 = vpop.xlane.xlu1 %670  ;;  %v1433_v25 = vsel %vm838_vm15, %v824_v51, -inf }
 0x15c   : > { %v673_v52 = vpop.xlane.xlu0 %672  ;;  %vm715_vm13 = vcmp.le.f32.partialorder %v1362_v57, %v671_v53 }
 0x15d   : > { %vm716_vm2 = vcmp.le.f32.partialorder %v1362_v57, %v673_v52  ;;  %vm731_vm3 = vmand %vm699_vm14, %vm715_vm13  ;;  %vm702_vm13 = vcmp.lt.f32.partialorder %v1357_v40, %v1362_v57 }
 0x15e   : > { %vm732_vm8 = vmand %vm700_vm5, %vm716_vm2 }
 0x15f   : > { %v675_v58 = vpop.xlane.xlu1 %674 }
 0x160   : > { %v677_v54 = vpop.xlane.xlu0 %676  ;;  %vm717_vm4 = vcmp.le.f32.partialorder %v1362_v57, %v675_v58 }
 0x161   : > { %vm733_vm9 = vmand %vm701_vm6, %vm717_vm4  ;;  %vm718_vm11 = vcmp.le.f32.partialorder %v1362_v57, %v677_v54 }
 0x162   : > { %vm734_vm14 = vmand %vm702_vm13, %vm718_vm11 }
 0x163   : > { %v599_v60 = vpop.xlane.xlu1 %598 }
 0x164   : > { %v1390_v59 = vpop.xlane.xlu0 %600  ;;  %vm703_vm4 = vcmp.lt.f32.partialorder %v599_v60, %v1362_v57 }
 0x165   : > { %vm704_vm5 = vcmp.lt.f32.partialorder %v1390_v59, %v1362_v57 }
 0x167   : > { %v1394_v63 = vpop.xlane.xlu1 %602 }
 0x168   : > { %v1392_v61 = vpop.xlane.xlu0 %604 }
 0x16b   : > { %v679_v4 = vpop.xlane.xlu1 %678 }
 0x16c   : > { %v681_v1 = vpop.xlane.xlu0 %680  ;;  %vm719_vm2 = vcmp.le.f32.partialorder %v1362_v57, %v679_v4 }
 0x16d   : > { %vm1452_vm7 = vmand %vm703_vm4, %vm719_vm2  ;;  %vm706_vm2 = vcmp.lt.f32.partialorder %v1392_v61, %v1362_v57 }
 0x16f   : > { %v1398_v7 = vpop.xlane.xlu1 %682 }
 0x170   : > { %v1396_v6 = vpop.xlane.xlu0 %684 }
 0x171   : > { %vm722_vm10 = vcmp.le.f32.partialorder %v1362_v57, %v1396_v6 }
 0x173   : > { %v1402_v8 = vpop.xlane.xlu1 %606 }
 0x174   : > { %v1400_v0 = vpop.xlane.xlu0 %608  ;;  %vm707_vm11 = vcmp.lt.f32.partialorder %v1402_v8, %v1362_v57 }
 0x177   : > { %v1406_v10 = vpop.xlane.xlu1 %610 }
 0x178   : > { %v1404_v9 = vpop.xlane.xlu0 %612 }
 0x17b   : > { %v687_v12 = vpop.xlane.xlu1 %686 }
 0x17c   : > { %v1408_v11 = vpop.xlane.xlu0 %688  ;;  %vm723_vm6 = vcmp.le.f32.partialorder %v1362_v57, %v687_v12 }
 0x17d   : > { %vm724_vm13 = vcmp.le.f32.partialorder %v1362_v57, %v1408_v11 }
 0x17f   : > { %v1412_v14 = vpop.xlane.xlu1 %690 }
 0x180   : > { %v1410_v13 = vpop.xlane.xlu0 %692 }
 0x183   : > { %v757_v16 = vpop.permute.xlu1 %756 }
 0x184   : > { %v761_v15 = vpop.permute.xlu0 %760  ;;  %v825_v29 = vsel %vm730_vm12, %v757_v16, -inf  ;;  %vm705_vm12 = vcmp.lt.f32.partialorder %v1394_v63, %v1362_v57 }
 0x185   : > { %v826_v17 = vsel %vm731_vm3, %v761_v15, -inf  ;;  %v842_v35 = vsel %vm838_vm15, %v825_v29, -inf  ;;  %vm720_vm3 = vcmp.le.f32.partialorder %v1362_v57, %v681_v1 }
 0x186   : > { %v1423_v18 = vsel %vm838_vm15, %v826_v17, -inf }
 0x187   : > { %v844_v19 = vmax.f32 %v1420_v3, %v1423_v18  ;;  %v765_v22 = vpop.permute.xlu1 %764 }
 0x188   : > { %v769_v20 = vpop.permute.xlu0 %768  ;;  %v827_v24 = vsel %vm732_vm8, %v765_v22, -inf  ;;  %vm721_vm8 = vcmp.le.f32.partialorder %v1362_v57, %v1398_v7 }
 0x189   : > { %v828_v23 = vsel %vm733_vm9, %v769_v20, -inf  ;;  %v845_v28 = vsel %vm838_vm15, %v827_v24, -inf  ;;  %vm1458_vm9 = vmand %vm704_vm5, %vm720_vm3  ;;  %vm725_vm3 = vcmp.le.f32.partialorder %v1362_v57, %v1412_v14  ;;  %vm708_vm5 = vcmp.lt.f32.partialorder %v1400_v0, %v1362_v57 }
 0x18a   : > { %v1436_v26 = vsel %vm838_vm15, %v828_v23, -inf  ;;  %v846_v31 = vmax.f32 %v840_v27, %v845_v28  ;;  %vm1482_vm4 = vmand %vm705_vm12, %vm721_vm8  ;;  %v907_v28 = vsel %vm388_vm1, %v1222_v55, 0.0  ;;  %vm921_vm1 = vcmp.eq.s32.totalorder %v1302_v62, 0 }
 0x18b   : > { %v848_v30 = vmax.f32 %v1433_v25, %v1436_v26  ;;  %v773_v33 = vpop.permute.xlu1 %772  ;;  %vm740_vm8 = vmand %vm708_vm5, %vm724_vm13 }
 0x18c   : > { %v777_v32 = vpop.permute.xlu0 %776  ;;  %v829_v34 = vsel %vm734_vm14, %v773_v33, -inf  ;;  %vm1474_vm14 = vmand %vm707_vm11, %vm723_vm6  ;;  %vm710_vm11 = vcmp.lt.f32.partialorder %v1404_v9, %v1362_v57 }
 0x18d   : > { %v849_v36 = vsel %vm838_vm15, %v829_v34, -inf  ;;  %v830_v42 = vsel %vm1452_vm7, %v777_v32, -inf  ;;  %vm1495_vm6 = vmand %vm706_vm2, %vm722_vm10  ;;  %vm709_vm7 = vcmp.lt.f32.partialorder %v1406_v10, %v1362_v57 }
 0x18e   : > { %v850_v37 = vmax.f32 %v842_v35, %v849_v36  ;;  %v851_v49 = vsel %vm838_vm15, %v830_v42, -inf  ;;  %vm741_vm10 = vmand %vm709_vm7, %vm725_vm3 }
 0x18f   : > { %v781_v39 = vpop.permute.xlu1 %780  ;;  %v852_v60 = vmax.f32 %v844_v19, %v851_v49 }
 0x190   : > { %v785_v38 = vpop.permute.xlu0 %784  ;;  %v831_v43 = vsel %vm1458_vm9, %v781_v39, -inf  ;;  %vm726_vm9 = vcmp.le.f32.partialorder %v1362_v57, %v1410_v13 }
 0x191   : > { %v853_v50 = vsel %vm838_vm15, %v831_v43, -inf  ;;  %v832_v52 = vsel %vm1482_vm4, %v785_v38, -inf  ;;  %vm742_vm12 = vmand %vm710_vm11, %vm726_vm9 }
 0x192   : > { %v854_v61 = vmax.f32 %v846_v31, %v853_v50  ;;  %v855_v4 = vsel %vm838_vm15, %v832_v52, -inf  ;;  %v908_v31 = vsel %vm344_vm0, %v907_v28, 0.0  ;;  %v934_v50 = vstv %s1521_s28 }
 0x193   : > { %v789_v46 = vpop.permute.xlu1 %788  ;;  %v856_v12 = vmax.f32 %v848_v30, %v855_v4 }
 0x194   : > { %v793_v44 = vpop.permute.xlu0 %792  ;;  %v833_v53 = vsel %vm1495_vm6, %v789_v46, -inf }
 0x195   : > { %v834_v48 = vsel %vm1474_vm14, %v793_v44, -inf  ;;  %v857_v6 = vsel %vm838_vm15, %v833_v53, -inf }
 0x196   : > { %v859_v54 = vsel %vm838_vm15, %v834_v48, -inf  ;;  %v858_v14 = vmax.f32 %v850_v37, %v857_v6 }
 0x197   : > { %v797_v59 = vpop.permute.xlu1 %796  ;;  %v860_v0 = vmax.f32 %v852_v60, %v859_v54 }
 0x198   : > { %v801_v58 = vpop.permute.xlu0 %800  ;;  %v835_v1 = vsel %vm740_vm8, %v797_v59, -inf }
 0x199   : > { %v836_v63 = vsel %vm741_vm10, %v801_v58, -inf  ;;  %v861_v7 = vsel %vm838_vm15, %v835_v1, -inf }
 0x19a   : > { %v862_v8 = vmax.f32 %v854_v61, %v861_v7  ;;  %v863_v10 = vsel %vm838_vm15, %v836_v63, -inf }
 0x19b   : > { %v805_v11 = vpop.permute.xlu1 %804  ;;  %v864_v3 = vmax.f32 %v856_v12, %v863_v10 }
 0x19c   : > { %v867_v15 = vmax.f32 %v860_v0, %v862_v8  ;;  %v837_v16 = vsel %vm742_vm12, %v805_v11, -inf }
 0x19d   : > { %v865_v17 = vsel %vm838_vm15, %v837_v16, -inf }
 0x19e   : > { %v866_v18 = vmax.f32 %v858_v14, %v865_v17 }
 0x1a0   : > { %v868_v19 = vmax.f32 %v864_v3, %v866_v18 }
 0x1a2   : > { %v869_v20 = vmax.f32 %v867_v15, %v868_v19 }
 0x1a4   : > { %v870_v9 = vrot.slane %v869_v20, 4 }
 0x1a6   : > { %v871_v22 = vmax.f32 %v869_v20, %v870_v9 }
 0x1a8   : > { %v872_v23 = vrot.slane %v871_v22, 2 }
 0x1aa   : > { %v873_v24 = vmax.f32 %v871_v22, %v872_v23 }
 0x1ac   : > { %v874_v25 = vrot.slane %v873_v24, 1 }
 0x1ae   : > { %v875_v26 = vmax.f32 %v873_v24, %v874_v25 }
 0x1b0   : > { %1103 = vpush %v875_v26 }
 0x1e1   : > { %s1523_s29 = spop %1103 }
 0x1e2   : > { %v877_v57 = vstv %s1523_s29 }
 0x1e3   : > { %vm878_vm13 = vcmp.gt.f32.partialorder %v1227_v56, %v877_v57 }
 0x1e4   : > { %v891_v13 = vsel %vm878_vm13, %v1227_v56, 0.0  ;;  %v1090_v27 = vsel %vm878_vm13, 1.0, %v1135_v5 }
 0x1e5   : > { %v892_v29 = vsel %vm344_vm0, %v891_v13, 0.0  ;;  %v881_v30 = vsel %vm344_vm0, %v1090_v27, 0.0  ;;  %vm922_vm0 = vcmp.eq.s32.totalorder %v1302_v62, 1 }
 0x1e6   : > { %893 = vadd.xlane.f32.xlu1 %v892_v29  ;;  %882 = vadd.xlane.f32.xlu0 %v881_v30 }
 0x1ea   : > { %909 = vadd.xlane.f32.xlu0 %v908_v31 }
 0x273   : > { %v894_v32 = vpop.xlane.xlu1 %893  ;;  %v883_v33 = vpop.xlane.xlu0 %882 }
 0x274   : > { %v895_v34 = vrot.slane %v894_v32, 4  ;;  %v884_v35 = vrot.slane %v883_v33, 4 }
 0x276   : > { %v896_v56 = vadd.f32 %v895_v34, %v894_v32  ;;  %v885_v36 = vadd.f32 %v884_v35, %v883_v33 }
 0x277   : > { %v910_v5 = vpop.xlane.xlu0 %909 }
 0x278   : > { %v897_v37 = vrot.slane %v896_v56, 2  ;;  %v886_v38 = vrot.slane %v885_v36, 2  ;;  %v911_v2 = vrot.slane %v910_v5, 4 }
 0x27a   : > { %v898_v55 = vadd.f32 %v897_v37, %v896_v56  ;;  %v912_v39 = vadd.f32 %v911_v2, %v910_v5  ;;  %v887_v40 = vadd.f32 %v886_v38, %v885_v36 }
 0x27c   : > { %v913_v41 = vrot.slane %v912_v39, 2  ;;  %v888_v42 = vrot.slane %v887_v40, 1  ;;  %v899_v43 = vrot.slane %v898_v55, 1 }
 0x27e   : > { %v914_v44 = vadd.f32 %v913_v41, %v912_v39  ;;  %v889_v45 = vadd.f32 %v888_v42, %v887_v40  ;;  %v900_v46 = vadd.f32 %v899_v43, %v898_v55 }
 0x280   : > { %1105 = vpush %v889_v45  ;;  %v915_v47 = vrot.slane %v914_v44, 1 }
 0x281   : > { %1107 = vpush %v900_v46 }
 0x282   : > { %v916_v48 = vadd.f32 %v915_v47, %v914_v44 }
 0x284   : > { %1109 = vpush %v916_v48 }
 0x2b1   : > { %s1106_s30 = spop %1105 }
 0x2b2   : > { %s903_s7 = ssub.f32 %s1359_s27, %s1106_s30  ;;  %s1108_s9 = spop %1107 }
 0x2b4   : > { %s904_s8 = smul.f32 %s1523_s29, %s903_s7 }
 0x2b5   : > { %s1110_s11 = spop %1109 }
 0x2b6   : > { %s905_s10 = sadd.f32 %s1108_s9, %s904_s8 }
 0x2b8   : > { %s1575_s10 = smov (!%p902_p4, %s905_s10), 0.0 }
 0x2b9   : > { %s918_s12 = sadd.f32 %s1110_s11, %s1575_s10 }
 0x2bb   : > { %v932_v49 = vstv %s918_s12 }
 0x2bc   : > { %v933_v51 = vsel %vm922_vm0, %v932_v49, %v1331_v21 }
 0x2bd   : > { %v935_v52 = vsel %vm921_vm1, %v934_v50, %v933_v51 }
 0x2be   : > { %936 = vst [vmem:[%s332_s15] sm:$0x1] %v935_v52 }
 0x2bf PF: > { %s16_s21 = sadd.s32 1, %s1133_s21  }
 0x2c0   : > { %p13_p5 = scmp.ge.s32.totalorder %s16_s21, 4  }
 0x2c2   :  { %15 = sbr.rel (!%p13_p5) target bundleno = 1 (0x1), region = 89 }

</bundles_post_ra>
